<compile_context>
chip_gen: v7x
topology: tpu7x:2x2x1
jax: 0.10.0
libtpu: 0.0.40
codegen_flags: <defaults>
</compile_context>

<pallas_src>
import jax
import jax.numpy as jnp
from jax.experimental import pallas as pl
from jax.experimental.pallas import tpu as pltpu


# --------------------------------------------------------------------------- #
# Kernels
# --------------------------------------------------------------------------- #
def _pos_enc_flat_kernel(x_ref, te_ref, cls_ref, o_ref):
    # x_ref: (Bt, N*D)  te_ref: (1, N*D)  cls_ref: (1, D)  o_ref: (Bt, (N+1)*D)
    bt = o_ref.shape[0]
    d = cls_ref.shape[1]
    # Two contiguous, lane-dense stores; no concatenate, no sublane offset.
    o_ref[:, :d] = jnp.broadcast_to(cls_ref[...], (bt, d))
    o_ref[:, d:] = x_ref[...] + te_ref[...]


def _pos_enc_dsplit_kernel(x_ref, te_ref, cls_ref, o_ref):
    # x_ref: (Bt, N, Dt)  te_ref: (1, N, Dt)  cls_ref: (1, 1, Dt)  o_ref: (Bt, N+1, Dt)
    bt, _, dt = o_ref.shape
    o_ref[:, 0:1, :] = jnp.broadcast_to(cls_ref[...], (bt, 1, dt))
    o_ref[:, 1:, :] = x_ref[...] + te_ref[...]


# --------------------------------------------------------------------------- #
# Sizing helpers
# --------------------------------------------------------------------------- #
def _vmem_capacity_bytes():
    try:
        cap = int(pltpu.get_tpu_info().vmem_capacity_bytes)
        if cap > 0:
            return cap
    except Exception:
        pass
    return 128 << 20  # v5e / v6e physical VMEM


def _batch_tile_candidates(batch, sublane_dim):
    """Divisors of `batch` usable as a block dim.  If batch maps to the sublane
    dim of a 2-D block it must be a multiple of 8 or the full batch."""
    divs = [d for d in range(1, batch + 1) if batch % d == 0]
    if sublane_dim:
        divs = [d for d in divs if d % 8 == 0 or d == batch]
    return divs


def _pick_batch_tile(batch, per_row_bytes, target_bytes, min_steps, sublane_dim):
    divs = _batch_tile_candidates(batch, sublane_dim)
    fitting = [d for d in divs if d * per_row_bytes <= target_bytes]
    bt = fitting[-1] if fitting else divs[0]
    # Prefer >= min_steps grid steps (v7x: 2 per TensorCore) as long as the
    # blocks stay >= ~1 MiB, i.e. near the HBM roofline.
    if batch // bt < min_steps:
        for d in reversed(divs):
            if batch // d >= min_steps and d * per_row_bytes >= (1 << 20):
                bt = d
                break
    return bt


def _const_in_spec(block_shape, index_map, single_buffer):
    """Spec for an input whose block index never changes; its second pipeline
    buffer is dead VMEM, so request single buffering when supported."""
    if single_buffer and hasattr(pl, "Buffered"):
        try:
            return pl.BlockSpec(block_shape, index_map, pipeline_mode=pl.Buffered(1))
        except TypeError:
            pass
    return pl.BlockSpec(block_shape, index_map)


# --------------------------------------------------------------------------- #
# Public wrapper
# --------------------------------------------------------------------------- #
def positional_encoding_1d(x, time_embed, cls_token, *,
                           batch_tile=None, embed_tile=None, force_path=None):
    """Pallas TPU forward of PositionalEncoding1D.

    x:          [B, N, D] patch embeddings
    time_embed: [1, max_time_patches, D]
    cls_token:  [1, 1, D]
    returns:    [B, N+1, D], CLS token at patch index 0.
    """
    B, N, D = x.shape
    max_t = time_embed.shape[1]
    assert N <= max_t, f"num_patches={N} exceeds max_time_patches={max_t}"
    assert time_embed.shape == (1, max_t, D)
    assert cls_token.shape == (1, 1, D)

    dtype = x.dtype
    itemsize = jnp.dtype(dtype).itemsize
    te = time_embed if N == max_t else time_embed[:, :N, :]  # always pre-slice
    te = te.astype(dtype)
    cls = cls_token.astype(dtype)

    # ---- generation-aware budgets ------------------------------------------
    vmem_cap = _vmem_capacity_bytes()
    small_vmem = vmem_cap <= (65 << 20)           # v7x-like: 64 MiB VMEM, 3.2 TB/s
    target_block = (6 << 20) if small_vmem else (3 << 20)
    min_steps = 4 if small_vmem else 2            # v7x: >=2 steps per TensorCore
    budget = int(vmem_cap * 0.6)                  # all live pipeline buffers

    in_row = N * D * itemsize                     # one batch row of x
    out_row = (N + 1) * D * itemsize              # one batch row of the output

    def flat_bytes(bt):                           # x/out double-buffered, te/cls single
        return 2 * bt * (in_row + out_row) + in_row + D * itemsize

    flat_divs = _batch_tile_candidates(B, sublane_dim=True)
    path = force_path
    if path is None:
        path = "flat" if (flat_bytes(flat_divs[0]) <= budget or D % 128 != 0) else "dsplit"
    # TODO(synk): rows too large for VMEM with D not a multiple of 128 still use the
    # flat path; a patch-axis split across the CLS concat offset needs Element-offset
    # index maps, which are not used here for portability.

    if path == "flat":
        if batch_tile is None:
            batch_tile = _pick_batch_tile(B, max(in_row, out_row), target_block,
                                          min_steps, sublane_dim=True)
        assert B % batch_tile == 0, (B, batch_tile)
        grid = (B // batch_tile,)
        x_f = x.reshape(B, N * D)                 # free row-major reshapes
        te_f = te.reshape(1, N * D)
        cls_f = cls.reshape(1, D)
        blk = flat_bytes(batch_tile)
        vmem_limit = min(int(vmem_cap * 0.9), max(32 << 20, int(blk * 1.3) + (2 << 20)))

        def launch(single_buffer_consts):
            out = pl.pallas_call(
                _pos_enc_flat_kernel,
                out_shape=jax.ShapeDtypeStruct((B, (N + 1) * D), dtype),
                grid_spec=pltpu.PrefetchScalarGridSpec(
                    num_scalar_prefetch=0,
                    grid=grid,
                    in_specs=[
                        pl.BlockSpec((batch_tile, N * D), lambda b: (b, 0)),          # x
                        _const_in_spec((1, N * D), lambda b: (0, 0),                  # time_embed
                                       single_buffer_consts),
                        _const_in_spec((1, D), lambda b: (0, 0),                      # cls
                                       single_buffer_consts),
                    ],
                    out_specs=pl.BlockSpec((batch_tile, (N + 1) * D), lambda b: (b, 0)),
                ),
                compiler_params=pltpu.CompilerParams(
                    dimension_semantics=("parallel",),
                    vmem_limit_bytes=vmem_limit,
                ),
            )(x_f, te_f, cls_f)
            return out.reshape(B, N + 1, D)

    else:  # "dsplit": tile the embed dim as a second grid axis (huge-row fallback)
        assert D % 128 == 0, "embed-dim split requires D to be a multiple of 128"

        def dsplit_bytes(bt, dt):
            return 2 * (bt * N * dt + bt * (N + 1) * dt + N * dt + dt) * itemsize

        if embed_tile is None:
            cands = [d for d in range(128, D + 1, 128) if D % d == 0]
            embed_tile = cands[0]
            for d in cands:  # largest tile that still fits target/budget
                if (N + 1) * d * itemsize <= target_block and dsplit_bytes(1, d) <= budget:
                    embed_tile = d
        assert D % embed_tile == 0 and embed_tile % 128 == 0, embed_tile
        if batch_tile is None:
            batch_tile = _pick_batch_tile(B, (N + 1) * embed_tile * itemsize,
                                          target_block, min_steps, sublane_dim=False)
        assert B % batch_tile == 0, (B, batch_tile)
        grid = (D // embed_tile, B // batch_tile)  # embed outer -> te/cls refetched rarely
        blk = dsplit_bytes(batch_tile, embed_tile)
        vmem_limit = min(int(vmem_cap * 0.9), max(32 << 20, int(blk * 1.3) + (2 << 20)))

        def launch(single_buffer_consts):
            del single_buffer_consts  # te/cls indices change with dj -> keep default buffering
            return pl.pallas_call(
                _pos_enc_dsplit_kernel,
                out_shape=jax.ShapeDtypeStruct((B, N + 1, D), dtype),
                grid_spec=pltpu.PrefetchScalarGridSpec(
                    num_scalar_prefetch=0,
                    grid=grid,
                    in_specs=[
                        pl.BlockSpec((batch_tile, N, embed_tile), lambda dj, b: (b, 0, dj)),
                        pl.BlockSpec((1, N, embed_tile), lambda dj, b: (0, 0, dj)),
                        pl.BlockSpec((1, 1, embed_tile), lambda dj, b: (0, 0, dj)),
                    ],
                    out_specs=pl.BlockSpec((batch_tile, N + 1, embed_tile),
                                           lambda dj, b: (b, 0, dj)),
                ),
                compiler_params=pltpu.CompilerParams(
                    dimension_semantics=("parallel", "parallel"),
                    vmem_limit_bytes=vmem_limit,
                ),
            )(x, te, cls)

    try:
        return launch(True)
    except Exception:  # pl.Buffered(1) unsupported on this runtime -> default buffering
        return launch(False)


# --------------------------------------------------------------------------- #
# Demo / correctness check
# --------------------------------------------------------------------------- #
if __name__ == "__main__":
    # Shapes consistent with the module: batch=2, num_patches=8, embed_dim=32,
    # max_time_patches=16.
    B, N, D = 2, 8, 32
    MAX_T = 16

    key = jax.random.PRNGKey(0)
    kx, kt, kc = jax.random.split(key, 3)

    x = jax.random.normal(kx, (B, N, D), dtype=jnp.float32)
    time_embed = jax.random.normal(kt, (1, MAX_T, D), dtype=jnp.float32)
    cls_token = jax.random.normal(kc, (1, 1, D), dtype=jnp.float32)

    out = jax.block_until_ready(positional_encoding_1d(x, time_embed, cls_token))
    ref = jnp.concatenate(
        [jnp.broadcast_to(cls_token, (B, 1, D)), x + time_embed[:, :N, :]], axis=1)
    assert out.shape == (B, N + 1, D), out.shape
    assert jnp.allclose(out, ref, atol=1e-6, rtol=1e-6)

    # Also exercise the embed-split fallback path (used for huge rows) at a
    # small, lane-aligned shape, forcing a 2-step embed axis.
    B2, N2, D2 = 2, 16, 256
    x2 = jax.random.normal(kx, (B2, N2, D2), dtype=jnp.float32)
    te2 = jax.random.normal(kt, (1, N2, D2), dtype=jnp.float32)
    cls2 = jax.random.normal(kc, (1, 1, D2), dtype=jnp.float32)
    out2 = jax.block_until_ready(
        positional_encoding_1d(x2, te2, cls2, force_path="dsplit", embed_tile=128))
    ref2 = jnp.concatenate([jnp.broadcast_to(cls2, (B2, 1, D2)), x2 + te2], axis=1)
    assert out2.shape == (B2, N2 + 1, D2), out2.shape
    assert jnp.allclose(out2, ref2, atol=1e-6, rtol=1e-6)

    print("KERNEL_OK")
</pallas_src>

<mosaic_0001>
module attributes {stable_mosaic.version = 11 : i64} {
  func.func @_pos_enc_flat_kernel(%arg0: i32, %arg1: memref<2x256xf32, #tpu.memory_space<vmem>>, %arg2: memref<1x256xf32, #tpu.memory_space<vmem>>, %arg3: memref<1x32xf32, #tpu.memory_space<vmem>>, %arg4: memref<2x288xf32, #tpu.memory_space<vmem>>) attributes {dimension_semantics = [#tpu.dimension_semantics<parallel>], iteration_bounds = array<i64: 1>, scalar_prefetch = 0 : i64, scratch_operands = 0 : i64, tpu.core_type = #tpu.core_type<tc>, window_params = [{transform_indices = @transform_0, window_bounds = array<i64: 2, 256>}, {pipeline_mode = #tpu.pipeline_mode<synchronous>, transform_indices = @transform_1, window_bounds = array<i64: 1, 256>}, {pipeline_mode = #tpu.pipeline_mode<synchronous>, transform_indices = @transform_2, window_bounds = array<i64: 1, 32>}, {transform_indices = @transform_3, window_bounds = array<i64: 2, 288>}]} {
    %c0 = arith.constant 0 : index
    %c0_0 = arith.constant 0 : index
    %0 = vector.load %arg3[%c0, %c0_0] : memref<1x32xf32, #tpu.memory_space<vmem>>, vector<1x32xf32>
    %1 = vector.shape_cast %0 : vector<1x32xf32> to vector<1x32xf32>
    %2 = vector.broadcast %1 : vector<1x32xf32> to vector<2x32xf32>
    %c0_1 = arith.constant 0 : index
    %c0_2 = arith.constant 0 : index
    %3 = vector.load %arg4[%c0_1, %c0_2] : memref<2x288xf32, #tpu.memory_space<vmem>>, vector<2x32xf32>
    tpu.vector_store %arg4[%c0_1, %c0_2], %2 {strides = array<i32>} : memref<2x288xf32, #tpu.memory_space<vmem>>, vector<2x32xf32>,
    %c0_3 = arith.constant 0 : index
    %c0_4 = arith.constant 0 : index
    %4 = vector.load %arg1[%c0_3, %c0_4] : memref<2x256xf32, #tpu.memory_space<vmem>>, vector<2x256xf32>
    %c0_5 = arith.constant 0 : index
    %c0_6 = arith.constant 0 : index
    %5 = vector.load %arg2[%c0_5, %c0_6] : memref<1x256xf32, #tpu.memory_space<vmem>>, vector<1x256xf32>
    %6 = vector.broadcast %5 : vector<1x256xf32> to vector<2x256xf32>
    %7 = arith.addf %4, %6 : vector<2x256xf32>
    %c0_7 = arith.constant 0 : index
    %c32 = arith.constant 32 : index
    %8 = vector.load %arg4[%c0_7, %c32] : memref<2x288xf32, #tpu.memory_space<vmem>>, vector<2x256xf32>
    tpu.vector_store %arg4[%c0_7, %c32], %7 {strides = array<i32>} : memref<2x288xf32, #tpu.memory_space<vmem>>, vector<2x256xf32>,
    return
  }
  func.func @transform_0(%arg0: i32) -> (i32, i32) {
    %c0_i32 = arith.constant 0 : i32
    %c0_i32_0 = arith.constant 0 : i32
    return %arg0, %c0_i32 : i32, i32
  }
  func.func @transform_1(%arg0: i32) -> (i32, i32) {
    %c0_i32 = arith.constant 0 : i32
    %c0_i32_0 = arith.constant 0 : i32
    %c0_i32_1 = arith.constant 0 : i32
    return %c0_i32, %c0_i32_0 : i32, i32
  }
  func.func @transform_2(%arg0: i32) -> (i32, i32) {
    %c0_i32 = arith.constant 0 : i32
    %c0_i32_0 = arith.constant 0 : i32
    %c0_i32_1 = arith.constant 0 : i32
    return %c0_i32, %c0_i32_0 : i32, i32
  }
  func.func @transform_3(%arg0: i32) -> (i32, i32) {
    %c0_i32 = arith.constant 0 : i32
    %c0_i32_0 = arith.constant 0 : i32
    return %arg0, %c0_i32 : i32, i32
  }
}

module attributes {stable_mosaic.version = 11 : i64} {
  func.func @_pos_enc_flat_kernel(%arg0: i32, %arg1: memref<2x256xf32, #tpu.memory_space<vmem>>, %arg2: memref<1x256xf32, #tpu.memory_space<vmem>>, %arg3: memref<1x32xf32, #tpu.memory_space<vmem>>, %arg4: memref<2x288xf32, #tpu.memory_space<vmem>>) attributes {dimension_semantics = [#tpu.dimension_semantics<parallel>], iteration_bounds = array<i64: 1>, scalar_prefetch = 0 : i64, scratch_operands = 0 : i64, tpu.core_type = #tpu.core_type<tc>, window_params = [{transform_indices = @transform_0, window_bounds = array<i64: 2, 256>}, {pipeline_mode = #tpu.pipeline_mode<synchronous>, transform_indices = @transform_1, window_bounds = array<i64: 1, 256>}, {pipeline_mode = #tpu.pipeline_mode<synchronous>, transform_indices = @transform_2, window_bounds = array<i64: 1, 32>}, {transform_indices = @transform_3, window_bounds = array<i64: 2, 288>}]} {
    %c0 = arith.constant 0 : index
    %c0_0 = arith.constant 0 : index
    %0 = vector.load %arg3[%c0, %c0_0] : memref<1x32xf32, #tpu.memory_space<vmem>>, vector<1x32xf32>
    %1 = vector.shape_cast %0 : vector<1x32xf32> to vector<1x32xf32>
    %2 = vector.broadcast %1 : vector<1x32xf32> to vector<2x32xf32>
    %c0_1 = arith.constant 0 : index
    %c0_2 = arith.constant 0 : index
    %3 = vector.load %arg4[%c0_1, %c0_2] : memref<2x288xf32, #tpu.memory_space<vmem>>, vector<2x32xf32>
    tpu.vector_store %arg4[%c0_1, %c0_2], %2 {strides = array<i32>} : memref<2x288xf32, #tpu.memory_space<vmem>>, vector<2x32xf32>,
    %c0_3 = arith.constant 0 : index
    %c0_4 = arith.constant 0 : index
    %4 = vector.load %arg1[%c0_3, %c0_4] : memref<2x256xf32, #tpu.memory_space<vmem>>, vector<2x256xf32>
    %c0_5 = arith.constant 0 : index
    %c0_6 = arith.constant 0 : index
    %5 = vector.load %arg2[%c0_5, %c0_6] : memref<1x256xf32, #tpu.memory_space<vmem>>, vector<1x256xf32>
    %6 = vector.broadcast %5 : vector<1x256xf32> to vector<2x256xf32>
    %7 = arith.addf %4, %6 : vector<2x256xf32>
    %c0_7 = arith.constant 0 : index
    %c32 = arith.constant 32 : index
    %8 = vector.load %arg4[%c0_7, %c32] : memref<2x288xf32, #tpu.memory_space<vmem>>, vector<2x256xf32>
    tpu.vector_store %arg4[%c0_7, %c32], %7 {strides = array<i32>} : memref<2x288xf32, #tpu.memory_space<vmem>>, vector<2x256xf32>,
    return
  }
  func.func @transform_0(%arg0: i32) -> (i32, i32) {
    %c0_i32 = arith.constant 0 : i32
    %c0_i32_0 = arith.constant 0 : i32
    return %arg0, %c0_i32 : i32, i32
  }
  func.func @transform_1(%arg0: i32) -> (i32, i32) {
    %c0_i32 = arith.constant 0 : i32
    %c0_i32_0 = arith.constant 0 : i32
    %c0_i32_1 = arith.constant 0 : i32
    return %c0_i32, %c0_i32_0 : i32, i32
  }
  func.func @transform_2(%arg0: i32) -> (i32, i32) {
    %c0_i32 = arith.constant 0 : i32
    %c0_i32_0 = arith.constant 0 : i32
    %c0_i32_1 = arith.constant 0 : i32
    return %c0_i32, %c0_i32_0 : i32, i32
  }
  func.func @transform_3(%arg0: i32) -> (i32, i32) {
    %c0_i32 = arith.constant 0 : i32
    %c0_i32_0 = arith.constant 0 : i32
    return %arg0, %c0_i32 : i32, i32
  }
}

</mosaic_0001>

<bundles_post_ra>
// kernel: tpu_custom_call.1
= control target key start
LH: loop header
LB: loop body
LE: loop exit
PB: predicated region body
PF: predicated region fallthrough
CT: control target
= control target key end

     0   :  { %8 = vsyncpa [#allocation3], 0  ;;  %s192_s0 = inlined_call_operand.hbm [shape: f32[2,256], index: 0, kind: input, shape index: {}]   ;;  %s193_s1 = inlined_call_operand.vmem [shape: f32[1,256], index: 1, kind: input, shape index: {}]   ;;  %s194_s2 = inlined_call_operand.vmem [shape: f32[1,32], index: 2, kind: input, shape index: {}]   ;;  %s195_s3 = inlined_call_operand.hbm [shape: f32[2,288], index: 3, kind: output, shape index: {}]  }
   0x1   :  { %9 = vsyncpa [#allocation4], 0  ;;  %s138_s12 = smov [#allocation2]   ;;  %s90_s16 = scalar_lea.hbm %s192_s0, 64 }
   0x2   :  { %s16_s13 = sshll.u32 %s138_s12, 4  ;;  %p91_p0 = scmp.ne.s32.totalorder %s192_s0, %s90_s16  ;;  %s17_s13 = int_to_ptr.vmem [resolvable:$true] %s16_s13 }
   0x3   :  { %p94_p1 = scmp.lt.u32.totalorder %s90_s16, %s192_s0 }
   0x5   :  { %p96_p2 = pnand %p94_p1, %p91_p0 }
   0x7   :  { %99 = shalt.err (!%p96_p2)
}
   0x8   :  { %s100_s21 = scalar_lea.vmem %s17_s13, 64  ;;  %p105_p4 = scmp.lt.s32.totalorder %s17_s13, %s17_s13 }
   0x9   :  { %p101_p3 = scmp.ne.s32.totalorder %s17_s13, %s100_s21  ;;  %p106_p5 = scmp.lt.s32.totalorder %s100_s21, %s100_s21 }
   0xb   :  { %p107_p6 = por %p106_p5, %p105_p4 }
   0xd   :  { %p108_p7 = pnand %p107_p6, %p101_p3 }
   0xf   :  { %111 = shalt.err (!%p108_p7)
}
  0x10   :  { %19 = dma.hbm_to_vmem [thread:$0]  %s192_s0, 64, %s17_s13, [#allocation3]  }
  0x11   :  { %134 = dma.done.wait [#allocation3], 64  }
  0x12   :  { %135 = vsyncadd [#allocation3], 4294967232  ;;  %v39_v0 = vlaneseq  ;;  %v139_v1 = vmov 1983009808   ;;  %vm34_vm0 = vcmask 254976   ;;  %s140_s0 = smov 32  }
  0x13   :  { %v49_v2 = vunpack.c.l.s4 %v139_v1  ;;  %v37_v7 = vld [vmem:[%s193_s1] sm:$0x3]  ;;  %vm64_vm1 = vcmask 1041664   ;;  %vm65_vm2 = vcmask 1043458   ;;  %vm67_vm4 = vcmask 259076   ;;  %s141_s28 = smov [#allocation5]  }
  0x14   :  { %v40_v3 = vshrl.u32 %v39_v0, 7  ;;  %v85_v8 = vld [vmem:[%s194_s2] ss:$0 sm:$0xff]  ;;  %vm66_vm3 = vmor %vm65_vm2, %vm64_vm1  ;;  %s76_s1 = sshll.u32 %s141_s28, 4  ;;  %vm61_vm5 = vcmask 261120   ;;  %s77_s1 = int_to_ptr.vmem [resolvable:$true] %s76_s1 }
  0x15   :  { %v50_v6 = vunpack.c.0.s8 %v49_v2  ;;  %35 = vst.msk [vmem:[#allocation5] sm:$0x3] %vm34_vm0, %v85_v8  ;;  %v36_v13 = vld [vmem:[#allocation2] sm:$0xf]  ;;  %vm68_vm6 = vmor %vm67_vm4, %vm66_vm3  ;;  %s112_s2 = scalar_lea.vmem %s77_s1, 96  ;;  %p117_p9 = scmp.lt.s32.totalorder %s77_s1, %s77_s1 }
  0x16   :  { %v41_v4 = vsub.s32 0, %v40_v3  ;;  %v45_v5 = vsub.s32 1, %v40_v3  ;;  %p113_p8 = scmp.ne.s32.totalorder %s77_s1, %s112_s2  ;;  %p118_p10 = scmp.lt.s32.totalorder %s112_s2, %s112_s2 }
  0x17   :  { %v53_v11 = vsub.s32 %v50_v6, %v40_v3 }
  0x18   :  { %v42_v9 = vrot.slane %v37_v7, %v41_v4  ;;  %v46_v10 = vrot.slane %v37_v7, %v45_v5  ;;  %p119_p11 = por %p118_p10, %p117_p9 }
  0x1a   :  { %v47_v12 = vcombine.low %v42_v9, %v46_v10  ;;  %p120_p12 = pnand %p119_p11, %p113_p8 }
  0x1c   :  { %v54_v14 = vrot.slane %v47_v12, %v53_v11 }
  0x1e   :  { %v56_v15 = vadd.f32 %v54_v14, %v36_v13 }
  0x20   :  { %58 = vrot.lane.b32.xlu0 %v56_v15, %s140_s0 }
  0x92   :  { %v59_v16 = vpop.permute.xlu0 %58 }
  0x93   :  { %v60_v17 = vrot.slane %v59_v16, 6 }
  0x95   :  { %v62_v18 = vsel %vm61_vm5, %v60_v17, %v59_v16 }
  0x96   :  { %69 = vst.msk [vmem:[#allocation5] sm:$0x3f] %vm68_vm6, %v62_v18 }
  0x97   :  { %123 = shalt.err (!%p120_p12)
}
  0x98   :  { %s124_s4 = scalar_lea.hbm %s195_s3, 96 }
  0x99   :  { %p125_p13 = scmp.ne.s32.totalorder %s195_s3, %s124_s4  ;;  %p128_p0 = scmp.lt.u32.totalorder %s124_s4, %s195_s3 }
  0x9b   :  { %p130_p1 = pnand %p128_p0, %p125_p13 }
  0x9d   :  { %133 = shalt.err (!%p130_p1)
}
  0x9e   :  { %79 = dma.vmem_to_hbm [thread:$0]  %s77_s1, 96, %s195_s3, [#allocation4]  }
  0x9f   :  { %136 = dma.done.wait [#allocation4], 96  }
  0xa0   :  { %137 = vsyncadd [#allocation4], 4294967200 }
  0xa1   :  { %83 = vsyncpa [#allocation3], 1 }
  0xa2   :  { %84 = vsyncpa [#allocation4], 1 }

// kernel: tpu_custom_call.1
= control target key start
LH: loop header
LB: loop body
LE: loop exit
PB: predicated region body
PF: predicated region fallthrough
CT: control target
= control target key end

     0   :  { %8 = vsyncpa [#allocation3], 0  ;;  %s192_s0 = inlined_call_operand.hbm [shape: f32[2,256], index: 0, kind: input, shape index: {}]   ;;  %s193_s1 = inlined_call_operand.vmem [shape: f32[1,256], index: 1, kind: input, shape index: {}]   ;;  %s194_s2 = inlined_call_operand.vmem [shape: f32[1,32], index: 2, kind: input, shape index: {}]   ;;  %s195_s3 = inlined_call_operand.hbm [shape: f32[2,288], index: 3, kind: output, shape index: {}]  }
   0x1   :  { %9 = vsyncpa [#allocation4], 0  ;;  %s138_s12 = smov [#allocation2]   ;;  %s90_s16 = scalar_lea.hbm %s192_s0, 64 }
   0x2   :  { %s16_s13 = sshll.u32 %s138_s12, 4  ;;  %p91_p0 = scmp.ne.s32.totalorder %s192_s0, %s90_s16  ;;  %s17_s13 = int_to_ptr.vmem [resolvable:$true] %s16_s13 }
   0x3   :  { %p94_p1 = scmp.lt.u32.totalorder %s90_s16, %s192_s0 }
   0x5   :  { %p96_p2 = pnand %p94_p1, %p91_p0 }
   0x7   :  { %99 = shalt.err (!%p96_p2)
}
   0x8   :  { %s100_s21 = scalar_lea.vmem %s17_s13, 64  ;;  %p105_p4 = scmp.lt.s32.totalorder %s17_s13, %s17_s13 }
   0x9   :  { %p101_p3 = scmp.ne.s32.totalorder %s17_s13, %s100_s21  ;;  %p106_p5 = scmp.lt.s32.totalorder %s100_s21, %s100_s21 }
   0xb   :  { %p107_p6 = por %p106_p5, %p105_p4 }
   0xd   :  { %p108_p7 = pnand %p107_p6, %p101_p3 }
   0xf   :  { %111 = shalt.err (!%p108_p7)
}
  0x10   :  { %19 = dma.hbm_to_vmem [thread:$0]  %s192_s0, 64, %s17_s13, [#allocation3]  }
  0x11   :  { %134 = dma.done.wait [#allocation3], 64  }
  0x12   :  { %135 = vsyncadd [#allocation3], 4294967232  ;;  %v39_v0 = vlaneseq  ;;  %v139_v1 = vmov 1983009808   ;;  %vm34_vm0 = vcmask 254976   ;;  %s140_s0 = smov 32  }
  0x13   :  { %v49_v2 = vunpack.c.l.s4 %v139_v1  ;;  %v37_v7 = vld [vmem:[%s193_s1] sm:$0x3]  ;;  %vm64_vm1 = vcmask 1041664   ;;  %vm65_vm2 = vcmask 1043458   ;;  %vm67_vm4 = vcmask 259076   ;;  %s141_s28 = smov [#allocation5]  }
  0x14   :  { %v40_v3 = vshrl.u32 %v39_v0, 7  ;;  %v85_v8 = vld [vmem:[%s194_s2] ss:$0 sm:$0xff]  ;;  %vm66_vm3 = vmor %vm65_vm2, %vm64_vm1  ;;  %s76_s1 = sshll.u32 %s141_s28, 4  ;;  %vm61_vm5 = vcmask 261120   ;;  %s77_s1 = int_to_ptr.vmem [resolvable:$true] %s76_s1 }
  0x15   :  { %v50_v6 = vunpack.c.0.s8 %v49_v2  ;;  %35 = vst.msk [vmem:[#allocation5] sm:$0x3] %vm34_vm0, %v85_v8  ;;  %v36_v13 = vld [vmem:[#allocation2] sm:$0xf]  ;;  %vm68_vm6 = vmor %vm67_vm4, %vm66_vm3  ;;  %s112_s2 = scalar_lea.vmem %s77_s1, 96  ;;  %p117_p9 = scmp.lt.s32.totalorder %s77_s1, %s77_s1 }
  0x16   :  { %v41_v4 = vsub.s32 0, %v40_v3  ;;  %v45_v5 = vsub.s32 1, %v40_v3  ;;  %p113_p8 = scmp.ne.s32.totalorder %s77_s1, %s112_s2  ;;  %p118_p10 = scmp.lt.s32.totalorder %s112_s2, %s112_s2 }
  0x17   :  { %v53_v11 = vsub.s32 %v50_v6, %v40_v3 }
  0x18   :  { %v42_v9 = vrot.slane %v37_v7, %v41_v4  ;;  %v46_v10 = vrot.slane %v37_v7, %v45_v5  ;;  %p119_p11 = por %p118_p10, %p117_p9 }
  0x1a   :  { %v47_v12 = vcombine.low %v42_v9, %v46_v10  ;;  %p120_p12 = pnand %p119_p11, %p113_p8 }
  0x1c   :  { %v54_v14 = vrot.slane %v47_v12, %v53_v11 }
  0x1e   :  { %v56_v15 = vadd.f32 %v54_v14, %v36_v13 }
  0x20   :  { %58 = vrot.lane.b32.xlu0 %v56_v15, %s140_s0 }
  0x92   :  { %v59_v16 = vpop.permute.xlu0 %58 }
  0x93   :  { %v60_v17 = vrot.slane %v59_v16, 6 }
  0x95   :  { %v62_v18 = vsel %vm61_vm5, %v60_v17, %v59_v16 }
  0x96   :  { %69 = vst.msk [vmem:[#allocation5] sm:$0x3f] %vm68_vm6, %v62_v18 }
  0x97   :  { %123 = shalt.err (!%p120_p12)
}
  0x98   :  { %s124_s4 = scalar_lea.hbm %s195_s3, 96 }
  0x99   :  { %p125_p13 = scmp.ne.s32.totalorder %s195_s3, %s124_s4  ;;  %p128_p0 = scmp.lt.u32.totalorder %s124_s4, %s195_s3 }
  0x9b   :  { %p130_p1 = pnand %p128_p0, %p125_p13 }
  0x9d   :  { %133 = shalt.err (!%p130_p1)
}
  0x9e   :  { %79 = dma.vmem_to_hbm [thread:$0]  %s77_s1, 96, %s195_s3, [#allocation4]  }
  0x9f   :  { %136 = dma.done.wait [#allocation4], 96  }
  0xa0   :  { %137 = vsyncadd [#allocation4], 4294967200 }
  0xa1   :  { %83 = vsyncpa [#allocation3], 1 }
  0xa2   :  { %84 = vsyncpa [#allocation4], 1 }

</bundles_post_ra>
